<compile_context>
chip_gen: v6e
topology: v6e:2x2x1
jax: 0.10.0
libtpu: 0.0.40
codegen_flags: <defaults>
</compile_context>

<pallas_src>
import functools

import jax
import jax.numpy as jnp
from jax.experimental import pallas as pl
from jax.experimental.pallas import tpu as pltpu


def _conv_bn_relu_kernel(x_ref, w_ref, shift_ref, o_ref, *, kh, kw, wp, m_t):
    # x_ref:     (1, C, TILE_IN)   bf16 channel-major row tile: (TH+KH-1) padded rows
    #                              flattened to lanes, + (KW-1) zero tail lanes.
    # w_ref:     (OC, KH*KW*C)     bf16 BN-scale-folded weights, taps packed into K.
    # shift_ref: (OC, 1)           f32 BN shift (beta - mean*scale).
    # o_ref:     (1, OC, TH*WP)    f32 lane-dense output tile (virtual width = WP).
    #
    # Build the packed LHS: the KH*KW statically-shifted (C, m_t) lane slices stacked along
    # the contraction (sublane) axis.  Concatenation is done in f32 (4-row sublane offsets
    # on packed bf16 would force packed-dtype relayouts) and packed to bf16 once for the MXU.
    taps = [
        x_ref[0, :, i * wp + j: i * wp + j + m_t].astype(jnp.float32)
        for i in range(kh) for j in range(kw)
    ]
    lhs = jnp.concatenate(taps, axis=0).astype(jnp.bfloat16)          # (KH*KW*C, m_t)
    acc = jnp.dot(w_ref[...], lhs, preferred_element_type=jnp.float32)  # (OC, m_t) f32
    o_ref[0] = jnp.maximum(acc + shift_ref[...], 0.0).astype(o_ref.dtype)


@functools.partial(jax.jit, static_argnames=("stride", "padding"))
def basic_conv2d(x, weight, gamma, beta, running_mean, running_var,
                 *, stride=1, padding=1, eps=1e-3):
    """x: (N, C, H, W) float32; weight: (OC, IC, KH, KW). Returns NCHW float output."""
    n, c, h, w = x.shape
    oc, ic, kh, kw = weight.shape
    assert ic == c
    assert stride == 1  # TODO(synk): stride > 1 not supported by the fused kernel

    hp, wp = h + 2 * padding, w + 2 * padding
    oh, ow = hp - kh + 1, wp - kw + 1

    # Row-tile size: ~8 output rows per grid step (largest divisor of OH <= 8), so the grid
    # has N * (OH/TH) steps -> >=2 steps per TensorCore on v7x for this test shape.
    th = oh
    for cand in range(min(oh, 8), 0, -1):
        if oh % cand == 0:
            th = cand
            break
    n_rt = oh // th
    m_t = th * wp                       # "virtual" output size per tile (full padded width)
    tile_rows = th + kh - 1             # input rows needed per tile (halo = kh-1)
    tile_in = tile_rows * wp + (kw - 1)  # flattened lanes + tail pad so tap slices stay in-bounds

    # Input glue (XLA, channel-major, no NHWC transpose): spatial pad, gather overlapping
    # row tiles, flatten rows into lanes, tail-pad, cast to bf16 (halves input HBM bytes).
    xp = jnp.pad(x, ((0, 0), (0, 0), (padding, padding), (padding, padding)))   # (N,C,HP,WP)
    xt = jnp.stack([xp[:, :, r * th: r * th + tile_rows, :] for r in range(n_rt)],
                   axis=1)                                                      # (N,n_rt,C,rows,WP)
    xt = xt.reshape(n * n_rt, c, tile_rows * wp)
    xt = jnp.pad(xt, ((0, 0), (0, 0), (0, kw - 1))).astype(jnp.bfloat16)        # (N*n_rt, C, tile_in)

    # Fold eval-mode BatchNorm: scale into the weights (then bf16), shift kept as (OC, 1) f32.
    inv = gamma / jnp.sqrt(running_var + eps)                                   # (OC,)
    w_packed = (weight * inv[:, None, None, None]).transpose(0, 2, 3, 1)        # (OC, KH, KW, C)
    w_packed = w_packed.reshape(oc, kh * kw * c).astype(jnp.bfloat16)           # (OC, KH*KW*C)
    shift = (beta - running_mean * inv).reshape(oc, 1).astype(jnp.float32)

    kernel = functools.partial(_conv_bn_relu_kernel, kh=kh, kw=kw, wp=wp, m_t=m_t)

    flops = 2 * n * oh * wp * c * kh * kw * oc
    bytes_accessed = (2 * (n * n_rt * c * tile_in + oc * kh * kw * c)
                      + 4 * (oc + n * n_rt * oc * m_t))

    out = pl.pallas_call(
        kernel,
        out_shape=jax.ShapeDtypeStruct((n * n_rt, oc, m_t), x.dtype),
        grid_spec=pltpu.PrefetchScalarGridSpec(
            num_scalar_prefetch=0,
            grid=(n * n_rt,),                                        # one (image, row-tile) per step
            in_specs=[
                pl.BlockSpec((1, c, tile_in), lambda g: (g, 0, 0)),  # channel-major row tile
                pl.BlockSpec((oc, kh * kw * c), lambda g: (0, 0)),   # packed weights, resident
                pl.BlockSpec((oc, 1), lambda g: (0, 0)),             # BN shift, resident
            ],
            out_specs=pl.BlockSpec((1, oc, m_t), lambda g: (g, 0, 0)),
        ),
        compiler_params=pltpu.CompilerParams(dimension_semantics=("parallel",)),
        cost_estimate=pl.CostEstimate(flops=flops, transcendentals=0,
                                      bytes_accessed=bytes_accessed),
    )(xt, w_packed, shift)

    # Reassemble row tiles and drop the virtual (garbage) width columns -> NCHW.
    out = out.reshape(n, n_rt, oc, th, wp).transpose(0, 2, 1, 3, 4).reshape(n, oc, oh, wp)
    return out[:, :, :, :ow]


def _reference(x, weight, gamma, beta, running_mean, running_var, *, stride, padding, eps=1e-3):
    y = jax.lax.conv_general_dilated(
        x, weight, window_strides=(stride, stride),
        padding=[(padding, padding), (padding, padding)],
        dimension_numbers=("NCHW", "OIHW", "NCHW"),
        precision=jax.lax.Precision.HIGHEST)
    inv = gamma / jnp.sqrt(running_var + eps)
    y = y * inv[None, :, None, None] + (beta - running_mean * inv)[None, :, None, None]
    return jnp.maximum(y, 0.0)


if __name__ == "__main__":
    key = jax.random.PRNGKey(0)
    k_x, k_w, k_g, k_b, k_m, k_v = jax.random.split(key, 6)

    # BasicConv2d(in_channels=4, out_channels=8, kernel_size=3, padding=1)
    N, C, H, W = 2, 4, 16, 16
    OC, KH, KW = 8, 3, 3
    stride, padding = 1, 1
    eps = 1e-3

    x = jax.random.normal(k_x, (N, C, H, W), dtype=jnp.float32)
    weight = jax.random.normal(k_w, (OC, C, KH, KW), dtype=jnp.float32) * 0.1
    gamma = jax.random.normal(k_g, (OC,), dtype=jnp.float32) * 0.1 + 1.0
    beta = jax.random.normal(k_b, (OC,), dtype=jnp.float32) * 0.1
    running_mean = jax.random.normal(k_m, (OC,), dtype=jnp.float32) * 0.1
    running_var = jnp.abs(jax.random.normal(k_v, (OC,), dtype=jnp.float32)) * 0.1 + 1.0

    out = basic_conv2d(x, weight, gamma, beta, running_mean, running_var,
                       stride=stride, padding=padding)
    out = jax.block_until_ready(out)
    assert out.shape == (N, OC, H, W), out.shape

    # (1) Tight check of the kernel's arithmetic: same BN folding, same bf16 operand
    #     rounding, f32 accumulation, computed with XLA's conv.
    inv = gamma / jnp.sqrt(running_var + eps)
    w_fold = (weight * inv[:, None, None, None]).astype(jnp.bfloat16).astype(jnp.float32)
    x_q = x.astype(jnp.bfloat16).astype(jnp.float32)
    y_q = jax.lax.conv_general_dilated(
        x_q, w_fold, window_strides=(stride, stride),
        padding=[(padding, padding), (padding, padding)],
        dimension_numbers=("NCHW", "OIHW", "NCHW"))
    ref_tight = jnp.maximum(y_q + (beta - running_mean * inv)[None, :, None, None], 0.0)
    assert jnp.allclose(out, ref_tight, rtol=1e-4, atol=1e-4), \
        float(jnp.abs(out - ref_tight).max())

    # (2) End-to-end vs. pure-f32 module semantics; tolerance covers bf16 rounding of the
    #     MXU operands (accumulation is f32).
    ref = _reference(x, weight, gamma, beta, running_mean, running_var,
                     stride=stride, padding=padding)
    assert jnp.allclose(out, ref, rtol=2e-2, atol=2e-2), float(jnp.abs(out - ref).max())

    print("KERNEL_OK")
</pallas_src>

<mosaic_0001>
module attributes {stable_mosaic.version = 11 : i64} {
  func.func @_conv_bn_relu_kernel(%arg0: i32, %arg1: memref<1x4x182xbf16, #tpu.memory_space<vmem>>, %arg2: memref<8x36xbf16, #tpu.memory_space<vmem>>, %arg3: memref<8x1xf32, #tpu.memory_space<vmem>>, %arg4: memref<1x8x144xf32, #tpu.memory_space<vmem>>) attributes {dimension_semantics = [#tpu.dimension_semantics<parallel>], iteration_bounds = array<i64: 4>, scalar_prefetch = 0 : i64, scratch_operands = 0 : i64, tpu.core_type = #tpu.core_type<tc>, window_params = [{transform_indices = @transform_0, window_bounds = array<i64: 1, 4, 182>}, {pipeline_mode = #tpu.pipeline_mode<synchronous>, transform_indices = @transform_1, window_bounds = array<i64: 8, 36>}, {pipeline_mode = #tpu.pipeline_mode<synchronous>, transform_indices = @transform_2, window_bounds = array<i64: 8, 1>}, {transform_indices = @transform_3, window_bounds = array<i64: 1, 8, 144>}]} {
    %c0 = arith.constant 0 : index
    %c0_0 = arith.constant 0 : index
    %c0_1 = arith.constant 0 : index
    %0 = vector.load %arg1[%c0, %c0_0, %c0_1] : memref<1x4x182xbf16, #tpu.memory_space<vmem>>, vector<1x4x144xbf16>
    %1 = vector.shape_cast %0 : vector<1x4x144xbf16> to vector<4x144xbf16>
    %2 = arith.extf %1 : vector<4x144xbf16> to vector<4x144xf32>
    %c0_2 = arith.constant 0 : index
    %c0_3 = arith.constant 0 : index
    %c1 = arith.constant 1 : index
    %3 = vector.load %arg1[%c0_2, %c0_3, %c1] : memref<1x4x182xbf16, #tpu.memory_space<vmem>>, vector<1x4x144xbf16>
    %4 = vector.shape_cast %3 : vector<1x4x144xbf16> to vector<4x144xbf16>
    %5 = arith.extf %4 : vector<4x144xbf16> to vector<4x144xf32>
    %c0_4 = arith.constant 0 : index
    %c0_5 = arith.constant 0 : index
    %c2 = arith.constant 2 : index
    %6 = vector.load %arg1[%c0_4, %c0_5, %c2] : memref<1x4x182xbf16, #tpu.memory_space<vmem>>, vector<1x4x144xbf16>
    %7 = vector.shape_cast %6 : vector<1x4x144xbf16> to vector<4x144xbf16>
    %8 = arith.extf %7 : vector<4x144xbf16> to vector<4x144xf32>
    %c0_6 = arith.constant 0 : index
    %c0_7 = arith.constant 0 : index
    %c18 = arith.constant 18 : index
    %9 = vector.load %arg1[%c0_6, %c0_7, %c18] : memref<1x4x182xbf16, #tpu.memory_space<vmem>>, vector<1x4x144xbf16>
    %10 = vector.shape_cast %9 : vector<1x4x144xbf16> to vector<4x144xbf16>
    %11 = arith.extf %10 : vector<4x144xbf16> to vector<4x144xf32>
    %c0_8 = arith.constant 0 : index
    %c0_9 = arith.constant 0 : index
    %c19 = arith.constant 19 : index
    %12 = vector.load %arg1[%c0_8, %c0_9, %c19] : memref<1x4x182xbf16, #tpu.memory_space<vmem>>, vector<1x4x144xbf16>
    %13 = vector.shape_cast %12 : vector<1x4x144xbf16> to vector<4x144xbf16>
    %14 = arith.extf %13 : vector<4x144xbf16> to vector<4x144xf32>
    %c0_10 = arith.constant 0 : index
    %c0_11 = arith.constant 0 : index
    %c20 = arith.constant 20 : index
    %15 = vector.load %arg1[%c0_10, %c0_11, %c20] : memref<1x4x182xbf16, #tpu.memory_space<vmem>>, vector<1x4x144xbf16>
    %16 = vector.shape_cast %15 : vector<1x4x144xbf16> to vector<4x144xbf16>
    %17 = arith.extf %16 : vector<4x144xbf16> to vector<4x144xf32>
    %c0_12 = arith.constant 0 : index
    %c0_13 = arith.constant 0 : index
    %c36 = arith.constant 36 : index
    %18 = vector.load %arg1[%c0_12, %c0_13, %c36] : memref<1x4x182xbf16, #tpu.memory_space<vmem>>, vector<1x4x144xbf16>
    %19 = vector.shape_cast %18 : vector<1x4x144xbf16> to vector<4x144xbf16>
    %20 = arith.extf %19 : vector<4x144xbf16> to vector<4x144xf32>
    %c0_14 = arith.constant 0 : index
    %c0_15 = arith.constant 0 : index
    %c37 = arith.constant 37 : index
    %21 = vector.load %arg1[%c0_14, %c0_15, %c37] : memref<1x4x182xbf16, #tpu.memory_space<vmem>>, vector<1x4x144xbf16>
    %22 = vector.shape_cast %21 : vector<1x4x144xbf16> to vector<4x144xbf16>
    %23 = arith.extf %22 : vector<4x144xbf16> to vector<4x144xf32>
    %c0_16 = arith.constant 0 : index
    %c0_17 = arith.constant 0 : index
    %c38 = arith.constant 38 : index
    %24 = vector.load %arg1[%c0_16, %c0_17, %c38] : memref<1x4x182xbf16, #tpu.memory_space<vmem>>, vector<1x4x144xbf16>
    %25 = vector.shape_cast %24 : vector<1x4x144xbf16> to vector<4x144xbf16>
    %26 = arith.extf %25 : vector<4x144xbf16> to vector<4x144xf32>
    %27 = tpu.concatenate %2, %5, %8, %11, %14, %17, %20, %23, %26 in 0 : vector<4x144xf32>, vector<4x144xf32>, vector<4x144xf32>, vector<4x144xf32>, vector<4x144xf32>, vector<4x144xf32>, vector<4x144xf32>, vector<4x144xf32>, vector<4x144xf32> -> vector<36x144xf32>
    %28 = arith.truncf %27 : vector<36x144xf32> to vector<36x144xbf16>
    %c0_18 = arith.constant 0 : index
    %c0_19 = arith.constant 0 : index
    %29 = vector.load %arg2[%c0_18, %c0_19] : memref<8x36xbf16, #tpu.memory_space<vmem>>, vector<8x36xbf16>
    %cst = arith.constant dense<0.000000e+00> : vector<8x144xf32>
    %30 = tpu.matmul %29, %28, %cst {dimension_numbers = #tpu.dot_dimension_numbers<[1], [0], [0], [1], [0, 0, 1, 1], [], []>} : vector<8x36xbf16>, vector<36x144xbf16>, vector<8x144xf32> -> vector<8x144xf32>
    %c0_20 = arith.constant 0 : index
    %c0_21 = arith.constant 0 : index
    %31 = vector.load %arg3[%c0_20, %c0_21] : memref<8x1xf32, #tpu.memory_space<vmem>>, vector<8x1xf32>
    %32 = vector.broadcast %31 : vector<8x1xf32> to vector<8x144xf32>
    %33 = arith.addf %30, %32 : vector<8x144xf32>
    %cst_22 = arith.constant 0.000000e+00 : f32
    %34 = vector.broadcast %cst_22 : f32 to vector<8x144xf32>
    %35 = arith.maximumf %33, %34 : vector<8x144xf32>
    %c0_23 = arith.constant 0 : index
    %c0_24 = arith.constant 0 : index
    %c0_25 = arith.constant 0 : index
    %36 = vector.load %arg4[%c0_23, %c0_24, %c0_25] : memref<1x8x144xf32, #tpu.memory_space<vmem>>, vector<1x8x144xf32>
    %37 = vector.shape_cast %36 : vector<1x8x144xf32> to vector<8x144xf32>
    %38 = vector.shape_cast %35 : vector<8x144xf32> to vector<1x8x144xf32>
    tpu.vector_store %arg4[%c0_23, %c0_24, %c0_25], %38 {strides = array<i32>} : memref<1x8x144xf32, #tpu.memory_space<vmem>>, vector<1x8x144xf32>,
    return
  }
  func.func @transform_0(%arg0: i32) -> (i32, i32, i32) {
    %c0_i32 = arith.constant 0 : i32
    %c0_i32_0 = arith.constant 0 : i32
    %c0_i32_1 = arith.constant 0 : i32
    return %arg0, %c0_i32, %c0_i32_0 : i32, i32, i32
  }
  func.func @transform_1(%arg0: i32) -> (i32, i32) {
    %c0_i32 = arith.constant 0 : i32
    %c0_i32_0 = arith.constant 0 : i32
    %c0_i32_1 = arith.constant 0 : i32
    return %c0_i32, %c0_i32_0 : i32, i32
  }
  func.func @transform_2(%arg0: i32) -> (i32, i32) {
    %c0_i32 = arith.constant 0 : i32
    %c0_i32_0 = arith.constant 0 : i32
    %c0_i32_1 = arith.constant 0 : i32
    return %c0_i32, %c0_i32_0 : i32, i32
  }
  func.func @transform_3(%arg0: i32) -> (i32, i32, i32) {
    %c0_i32 = arith.constant 0 : i32
    %c0_i32_0 = arith.constant 0 : i32
    %c0_i32_1 = arith.constant 0 : i32
    return %arg0, %c0_i32, %c0_i32_0 : i32, i32, i32
  }
}

</mosaic_0001>

<bundles_post_ra>
// kernel: basic_conv2d.1
= control target key start
LH: loop header
LB: loop body
LE: loop exit
PB: predicated region body
PF: predicated region fallthrough
CT: control target
= control target key end

     0   :  { %s486_s12 = smov 0   ;;  %s538_s0 = inlined_call_operand.vmem [shape: bf16[4,4,182], index: 0, kind: input, shape index: {}]   ;;  %s539_s1 = inlined_call_operand.vmem [shape: bf16[8,36], index: 1, kind: input, shape index: {}]   ;;  %s540_s2 = inlined_call_operand.vmem [shape: f32[8,1], index: 2, kind: input, shape index: {}]   ;;  %s541_s3 = inlined_call_operand.vmem [shape: f32[4,8,144], index: 3, kind: output, shape index: {}]  }
   0x1 LB: > { %s376_s13 = sadd.s32 4294967295, %s455_s12   ;;  %p380_p0 = scmp.ge.s32.totalorder %s455_s12, 1  ;;  %s455_s12 = sphi %s486_s12, %s13_s12  }
   0x2   : > { %p137_p1 = scmp.lt.s32.totalorder %s455_s12, 5 }
   0x4   : > { %p138_p2 = pnand %p380_p0, %p137_p1 }
   0x5   : > { %p161_p3 = scmp.lt.s32.totalorder (!%p138_p2), %s376_s13, 3  ;;  %s457_s18 = smov (!%p138_p2), 108  }
   0x6   : > { %141 = sbr.rel (%p138_p2) target bundleno = 358 (0x166), region = 32  ;;  %s458_s19 = smov (!%p138_p2), 90  }
   0x7   : > { %s459_s20 = smov (!%p138_p2), 92   ;;  %s460_s21 = smov (!%p138_p2), 109  }
   0x8   : > { %s462_s22 = smov (!%p138_p2), 127   ;;  %s463_s23 = smov (!%p138_p2), 91  }
   0x9   : > { %s464_s24 = smov (!%p138_p2), 110   ;;  %s465_s25 = smov (!%p138_p2), 126  }
   0xb   : > { %s543_s13 = smov (!%p161_p3, %s376_s13), 3  ;;  %v461_v6 = vmov 0   ;;  %v258_v7 = vld [vmem:[%s540_s2] sm:$0xff]  ;;  %vm238_vm0 = vcmask 736256   ;;  %vm268_vm1 = vcmask 1041408   ;;  %vm206_vm2 = vcmask 891904  }
   0xc   : > { %s389_s14 = sshll.u32 %s543_s13, 2  ;;  %307 = vmatprep.mubr.bf16.mxu0 %v461_v6  ;;  %448 = vset.pattern.permute.xlu0 %v461_v6  ;;  %vm214_vm3 = vcmask 883712   ;;  %vm222_vm4 = vcmask 752640   ;;  %vm182_vm5 = vcmask 1039360   ;;  %vm230_vm6 = vcmask 744448   ;;  %s390_s30 = sshll.u32 %s543_s13, 4 }
   0xd   : > { %s165_s17 = scalar_lea.vmem %s538_s0, %s389_s14  ;;  %vm242_vm7 = vcmask 1043456   ;;  %vm198_vm8 = vcmask 900096   ;;  %vm190_vm9 = vcmask 1031168   ;;  %v257_v55 = vld [vmem:[%s539_s1] sm:$0xf]  ;;  %vm264_vm10 = vcmask 293888   ;;  %s170_s6 = scalar_lea.vmem %s541_s3, %s390_s30 }
   0xe   : > { %v172_v0 = vld [vmem:[%s165_s17] sm:$0xf]  ;;  %vm319_vm11 = vcmask 130048  }
   0xf   : > { %v500_v1 = vunpack.c.l.bf16 %v172_v0 }
  0x11   : > { %v177_v2 = vcombine.low %v500_v1, %v500_v1  ;;  %v506_v3 = vcombine.high %v500_v1, %v500_v1 }
  0x13   : > { %v418_v4 = vpack.i.bf16 %v500_v1, %v177_v2  ;;  %v408_v5 = vpack.i.bf16 %v506_v3, %v500_v1 }
  0x15   : > { %419 = vrot.lane.b32.xlu1 %v418_v4, %s457_s18  ;;  %409 = vrot.lane.b32.xlu0 %v408_v5, %s458_s19 }
  0x19   : > { %424 = vrot.lane.b32.xlu1 %v408_v5, %s459_s20  ;;  %414 = vrot.lane.b32.xlu0 %v408_v5, %s460_s21 }
  0x1d   : > { %434 = vrot.lane.b32.xlu1 %v418_v4, %s462_s22  ;;  %429 = vrot.lane.b32.xlu0 %v418_v4, %s463_s23 }
  0x21   : > { %444 = vrot.lane.b32.xlu1 %v418_v4, %s464_s24  ;;  %439 = vrot.lane.b32.xlu0 %v408_v5, %s465_s25 }
  0x25   : > { %261 = vperm.xlu0 %448, %v258_v7  }
  0x87   : > { %v420_v8 = vpop.permute.xlu1 %419  ;;  %v410_v9 = vpop.permute.xlu0 %409 }
  0x88   : > { %v412_v10 = vunpack.i.h.bf16 %v410_v9  ;;  %v411_v11 = vunpack.i.l.bf16 %v410_v9  ;;  %v422_v19 = vunpack.i.h.bf16 %v420_v8  ;;  %v421_v20 = vunpack.i.l.bf16 %v420_v8 }
  0x8a   : > { %v256_v12 = vpack.c.bf16 %v412_v10, %v412_v10  ;;  %v239_v13 = vsel %vm238_vm0, %v411_v11, %v412_v10  ;;  %v215_v31 = vsel %vm214_vm3, %v421_v20, %v422_v19 }
  0x8b   : > { %v425_v14 = vpop.permute.xlu1 %424  ;;  %v415_v15 = vpop.permute.xlu0 %414  ;;  %v255_v16 = vpack.c.bf16 %v239_v13, %v239_v13 }
  0x8c   : > { %v417_v17 = vunpack.i.h.bf16 %v415_v15  ;;  %v416_v18 = vunpack.i.l.bf16 %v415_v15  ;;  %385 = vmatprep.subr.msk.bf16.mxu0 %vm268_vm1, %v256_v12  ;;  %v427_v22 = vunpack.i.h.bf16 %v425_v14  ;;  %v426_v23 = vunpack.i.l.bf16 %v425_v14 }
  0x8d   : > { %v270_v21 = vsel %vm268_vm1, %v255_v16, 0 }
  0x8e   : > { %286 = vmatpush1.bf16.msra.mxu0 %v270_v21  ;;  %v207_v24 = vsel %vm206_vm2, %v416_v18, %v417_v17  ;;  %v223_v32 = vsel %vm222_vm4, %v426_v23, %v427_v22  ;;  %v248_v34 = vsel %vm242_vm7, %v417_v17, %v422_v19 }
  0x8f   : > { %v435_v25 = vpop.permute.xlu1 %434  ;;  %v430_v26 = vpop.permute.xlu0 %429  ;;  %v247_v40 = vsel %vm242_vm7, %v207_v24, %v215_v31 }
  0x90   : > { %v437_v27 = vunpack.i.h.bf16 %v435_v25  ;;  %v436_v28 = vunpack.i.l.bf16 %v435_v25  ;;  %v432_v29 = vunpack.i.h.bf16 %v430_v26  ;;  %v431_v30 = vunpack.i.l.bf16 %v430_v26 }
  0x92   : > { %v231_v33 = vsel %vm230_vm6, %v431_v30, %v432_v29  ;;  %v250_v35 = vsel %vm242_vm7, %v427_v22, %v432_v29  ;;  %v183_v36 = vsel %vm182_vm5, %v436_v28, %v437_v27  ;;  %v244_v49 = vsel %vm242_vm7, %v506_v3, %v437_v27 }
  0x93   : > { %v445_v37 = vpop.permute.xlu1 %444  ;;  %v440_v38 = vpop.permute.xlu0 %439  ;;  %v254_v39 = vpack.c.bf16 %v250_v35, %v248_v34  ;;  %v249_v41 = vsel %vm242_vm7, %v223_v32, %v231_v33  ;;  %v243_v52 = vsel %vm242_vm7, %v500_v1, %v183_v36 }
  0x94   : > { %v447_v42 = vunpack.i.h.bf16 %v445_v37  ;;  %v446_v43 = vunpack.i.l.bf16 %v445_v37  ;;  %v442_v44 = vunpack.i.h.bf16 %v440_v38  ;;  %v441_v45 = vunpack.i.l.bf16 %v440_v38 }
  0x95   : > { %287 = vmatprep.subr.bf16.mxu0 %v254_v39  ;;  %v253_v46 = vpack.c.bf16 %v249_v41, %v247_v40 }
  0x96   : > { %v199_v47 = vsel %vm198_vm8, %v446_v43, %v447_v42  ;;  %v191_v48 = vsel %vm190_vm9, %v441_v45, %v442_v44  ;;  %v246_v50 = vsel %vm242_vm7, %v442_v44, %v447_v42 }
  0x97   : > { %288 = vmatpush1.bf16.msra.mxu0 %v253_v46  ;;  %v252_v51 = vpack.c.bf16 %v246_v50, %v244_v49  ;;  %v245_v53 = vsel %vm242_vm7, %v191_v48, %v199_v47 }
  0x98   : > { %v251_v54 = vpack.c.bf16 %v245_v53, %v243_v52 }
  0x99   : > { %289 = vmatprep.subr.bf16.mxu0 %v252_v51 }
  0x9b   : > { %290 = vmatpush1.bf16.msra.mxu0 %v251_v54 }
  0x9e   : > { %386 = vmatmul.mubr.msk.bf16.vlgmr.msra.gmra.mxu0 %vm264_vm10, %v257_v55 }
  0xa0   : > { %v262_v56 = vpop.permute.xlu0 %261 }
 0x15e   : > { %v309_v57 = vpop.f32.mrf.mxu0 }
 0x15f   : > { %v310_v58 = vadd.f32 %v309_v57, %v262_v56 }
 0x160   : > { %v311_v59 = vpop.f32.mrf.mxu0 }
 0x161   : > { %v316_v60 = vmax.f32 %v310_v58, 0.0  ;;  %v312_v61 = vadd.f32 %v311_v59, %v262_v56 }
 0x162   : > { %v313_v62 = vpop.f32.mrf.mxu0 }
 0x163   : > { %318 = vst [vmem:[%s170_s6] sm:$0xff] %v316_v60  ;;  %v317_v63 = vmax.f32 %v312_v61, 0.0 }
 0x164   : > { %v314_v0 = vpop.f32.mrf.mxu0 }
 0x165   : > { %320 = vst.msk [vmem:[%s170_s6 + $0x8] sm:$0xff] %vm319_vm11, %v317_v63 }
 0x166 PF: > { %s13_s12 = sadd.s32 1, %s455_s12  }
 0x167   : > { %p10_p4 = scmp.ge.s32.totalorder %s13_s12, 6  }
 0x169   :  { %12 = sbr.rel (!%p10_p4) target bundleno = 1 (0x1), region = 62 }

</bundles_post_ra>
